<compile_context>
chip_gen: v7x
topology: tpu7x:2x2x1
jax: 0.10.0
libtpu: 0.0.40
codegen_flags: <defaults>
</compile_context>

<pallas_src>
import functools

import jax
import jax.numpy as jnp
from jax import lax
from jax.experimental import pallas as pl
from jax.experimental.pallas import tpu as pltpu


def _sent_raw_kernel(x_ref, w1t_ref, b1_ref, w2t_ref, b2_ref, o_ref, *, true_hw):
    # x_ref block: (TB, C, HWp); w1t (C, Cr), b1 (1, Cr), w2t (Cr, C), b2 (1, C)
    x = x_ref[...]                                   # (TB, C, HWp), input dtype
    tb, c, hw_pad = x.shape
    xf = x.astype(jnp.float32)                       # f32 accumulation (bf16-safe)

    # Global pooling over the spatial (lane) axis -> (TB, C), C on lanes.
    avg = jnp.sum(xf, axis=-1) * (1.0 / true_hw)     # padded lanes are 0 -> sum ok
    if hw_pad != true_hw:
        lane = lax.broadcasted_iota(jnp.int32, (1, 1, hw_pad), 2)
        mx = jnp.max(jnp.where(lane < true_hw, xf, -jnp.inf), axis=-1)
    else:
        mx = jnp.max(xf, axis=-1)                    # (TB, C)

    # Fuse avg/max branches of the shared MLP into one lane-dense matmul pair.
    # Pad so the two halves split on an 8-sublane boundary.
    tb8 = ((tb + 7) // 8) * 8
    if tb8 != tb:
        z = jnp.zeros((tb8 - tb, c), jnp.float32)
        pooled = jnp.concatenate([avg, z, mx, z], axis=0)          # (2*tb8, C)
    else:
        pooled = jnp.concatenate([avg, mx], axis=0)                # (2*tb, C)

    h = jnp.dot(pooled, w1t_ref[...],
                preferred_element_type=jnp.float32) + b1_ref[...]  # (2*tb8, Cr)
    h = jnp.maximum(h, 0.0)                                        # ReLU
    y = jnp.dot(h, w2t_ref[...],
                preferred_element_type=jnp.float32) + b2_ref[...]  # (2*tb8, C)

    s = y[:tb] + y[tb8:tb8 + tb]                     # avg-branch + max-branch
    s = jnp.clip(s * (1.0 / 6.0) + 0.5, 0.0, 1.0)    # hardsigmoid

    o_ref[...] = (xf * s[:, :, None]).astype(o_ref.dtype)   # broadcast over HW


def _tpu_vmem_capacity_bytes():
    """Physical VMEM of the current chip; falls back to 128 MiB (v5e/v6e)."""
    try:
        info = pltpu.get_tpu_info()
        cap = getattr(info, "vmem_capacity_bytes", None)
        if cap:
            return int(cap)
    except Exception:
        pass
    return 128 << 20


def sent_raw_forward(x, w1, b1, w2, b2):
    """x: (N, C, H, W) float32/bfloat16 (NCHW, same as PyTorch).
    w1: (C/r, C), b1: (C/r,), w2: (C, C/r), b2: (C,)  -- 1x1 conv params."""
    N, C, H, W = x.shape
    HW = H * W
    Cr = w1.shape[0]
    itemsize = jnp.dtype(x.dtype).itemsize

    # ---- generation-aware tiling / VMEM budget ------------------------------
    vmem_cap = _tpu_vmem_capacity_bytes()
    two_tensorcores = vmem_cap <= (64 << 20)         # v7x-like: 2 TCs, 64 MiB/TC
    if two_tensorcores:
        target_tile_bytes = 6 << 20                  # smaller VMEM, 2 cores
        vmem_ceiling = 52 << 20
    else:
        target_tile_bytes = 8 << 20                  # v5e/v6e: 128 MiB physical
        vmem_ceiling = 100 << 20

    # Lane-dense output stores: pad HW up to a multiple of 128 when needed
    # (masked vst.msk partial stores measured up to ~4.5x slower writeback).
    HWp = ((HW + 127) // 128) * 128
    slab_bytes = C * HWp * itemsize                  # one image's bytes per tile row

    weight_bytes = (2 * C * Cr + Cr + C) * 4
    margin = 2 << 20

    # Largest TB whose double-buffered in+out tiles fit under the ceiling,
    # near the per-generation tile target.
    tb_cap = max(1, (vmem_ceiling - 2 * weight_bytes - margin) // (4 * slab_bytes))
    TB = max(1, min(N, target_tile_bytes // max(slab_bytes, 1), tb_cap))
    # Only on 2-TensorCore chips: make sure both cores get a grid step.
    if two_tensorcores and TB >= N and N >= 2:
        TB = (N + 1) // 2
    TB = int(TB)

    grid_n = int(pl.cdiv(N, TB))
    Np = grid_n * TB

    # TODO(synk): for very large single-image slabs (C*HWp*itemsize >> tile
    # target with TB=1), split HW over a second "arbitrary" grid axis with a
    # pool-then-scale two-phase structure instead of relying on the VMEM ceiling.

    x_flat = x.reshape(N, C, HW)
    if Np != N or HWp != HW:
        # Zero padding: padded lanes/rows never affect the real outputs
        # (sum pads with 0, max masks with -inf, padded rows are sliced off).
        x_flat = jnp.pad(x_flat, ((0, Np - N), (0, 0), (0, HWp - HW)))

    # Row-major MLP: keep C on the lane axis -> pre-transpose weights once here.
    w1t = jnp.asarray(w1, jnp.float32).T             # (C, Cr)
    w2t = jnp.asarray(w2, jnp.float32).T             # (Cr, C)
    b1r = jnp.asarray(b1, jnp.float32).reshape(1, Cr)
    b2r = jnp.asarray(b2, jnp.float32).reshape(1, C)

    tile_bytes = TB * slab_bytes
    needed = 4 * tile_bytes + 2 * weight_bytes + margin
    vmem_limit = int(min(max(needed, 32 << 20), vmem_ceiling))

    kernel = functools.partial(_sent_raw_kernel, true_hw=HW)

    out_flat = pl.pallas_call(
        kernel,
        out_shape=jax.ShapeDtypeStruct((Np, C, HWp), x.dtype),
        grid_spec=pltpu.PrefetchScalarGridSpec(
            num_scalar_prefetch=0,
            grid=(grid_n,),
            in_specs=[
                pl.BlockSpec((TB, C, HWp), lambda n: (n, 0, 0)),
                pl.BlockSpec((C, Cr), lambda n: (0, 0)),
                pl.BlockSpec((1, Cr), lambda n: (0, 0)),
                pl.BlockSpec((Cr, C), lambda n: (0, 0)),
                pl.BlockSpec((1, C), lambda n: (0, 0)),
            ],
            out_specs=pl.BlockSpec((TB, C, HWp), lambda n: (n, 0, 0)),
        ),
        compiler_params=pltpu.CompilerParams(
            dimension_semantics=("parallel",),
            vmem_limit_bytes=vmem_limit,
        ),
        cost_estimate=pl.CostEstimate(
            flops=2 * (2 * Np) * C * Cr * 2 + Np * C * HWp,
            transcendentals=0,
            bytes_accessed=2 * Np * C * HWp * itemsize,
        ),
    )(x_flat, w1t, b1r, w2t, b2r)

    if Np != N or HWp != HW:
        out_flat = out_flat[:N, :, :HW]
    return out_flat.reshape(N, C, H, W)


def init_params(channels=16, reduction=4, seed=0):
    """Deterministic synthetic params matching nn.Conv2d(..., kernel_size=1) shapes."""
    cr = channels // reduction
    k1, k2, k3, k4 = jax.random.split(jax.random.PRNGKey(seed), 4)
    # Conv2d(C, C/r, 1): weight (C/r, C, 1, 1) -> (C/r, C), bias (C/r,)
    bound1 = 1.0 / (channels ** 0.5)
    w1 = jax.random.uniform(k1, (cr, channels), jnp.float32, -bound1, bound1)
    b1 = jax.random.uniform(k2, (cr,), jnp.float32, -bound1, bound1)
    # Conv2d(C/r, C, 1): weight (C, C/r, 1, 1) -> (C, C/r), bias (C,)
    bound2 = 1.0 / (cr ** 0.5)
    w2 = jax.random.uniform(k3, (channels, cr), jnp.float32, -bound2, bound2)
    b2 = jax.random.uniform(k4, (channels,), jnp.float32, -bound2, bound2)
    return w1, b1, w2, b2


def _reference(x, w1, b1, w2, b2):
    # Pure-JAX reference of the PyTorch forward (for sanity check).
    avg = jnp.mean(x, axis=(2, 3))                   # (N, C)
    mx = jnp.max(x, axis=(2, 3))                     # (N, C)

    def fc(v):
        h = jnp.maximum(v @ w1.T + b1, 0.0)
        return h @ w2.T + b2

    s = fc(avg) + fc(mx)
    s = jnp.clip(s / 6.0 + 0.5, 0.0, 1.0)            # hardsigmoid
    return x * s[:, :, None, None]


if __name__ == "__main__":
    # Case 1: module-default shape, HW already a multiple of 128.
    N, C, H, W = 2, 16, 16, 16
    reduction = 4
    x = jax.random.normal(jax.random.PRNGKey(0), (N, C, H, W), jnp.float32)
    w1, b1, w2, b2 = init_params(channels=C, reduction=reduction, seed=0)

    out = sent_raw_forward(x, w1, b1, w2, b2)
    jax.block_until_ready(out)
    ref = _reference(x, w1, b1, w2, b2)
    assert out.shape == (N, C, H, W)
    assert jnp.allclose(out, ref, atol=1e-5, rtol=1e-5), "mismatch vs reference (16x16)"

    # Case 2: awkward shapes (HW % 128 != 0, N not matching TB) to exercise
    # the lane-padding + batch-padding paths.
    N2, H2, W2 = 3, 7, 7
    x2 = jax.random.normal(jax.random.PRNGKey(1), (N2, C, H2, W2), jnp.float32)
    out2 = sent_raw_forward(x2, w1, b1, w2, b2)
    jax.block_until_ready(out2)
    ref2 = _reference(x2, w1, b1, w2, b2)
    assert out2.shape == (N2, C, H2, W2)
    assert jnp.allclose(out2, ref2, atol=1e-5, rtol=1e-5), "mismatch vs reference (7x7)"

    print("KERNEL_OK")
</pallas_src>

<mosaic_0001>
module attributes {stable_mosaic.version = 11 : i64} {
  func.func @_sent_raw_kernel(%arg0: i32, %arg1: memref<2x16x256xf32, #tpu.memory_space<vmem>>, %arg2: memref<16x4xf32, #tpu.memory_space<vmem>>, %arg3: memref<1x4xf32, #tpu.memory_space<vmem>>, %arg4: memref<4x16xf32, #tpu.memory_space<vmem>>, %arg5: memref<1x16xf32, #tpu.memory_space<vmem>>, %arg6: memref<2x16x256xf32, #tpu.memory_space<vmem>>) attributes {dimension_semantics = [#tpu.dimension_semantics<parallel>], iteration_bounds = array<i64: 1>, scalar_prefetch = 0 : i64, scratch_operands = 0 : i64, tpu.core_type = #tpu.core_type<tc>, window_params = [{transform_indices = @transform_0, window_bounds = array<i64: 2, 16, 256>}, {pipeline_mode = #tpu.pipeline_mode<synchronous>, transform_indices = @transform_1, window_bounds = array<i64: 16, 4>}, {pipeline_mode = #tpu.pipeline_mode<synchronous>, transform_indices = @transform_2, window_bounds = array<i64: 1, 4>}, {pipeline_mode = #tpu.pipeline_mode<synchronous>, transform_indices = @transform_3, window_bounds = array<i64: 4, 16>}, {pipeline_mode = #tpu.pipeline_mode<synchronous>, transform_indices = @transform_4, window_bounds = array<i64: 1, 16>}, {transform_indices = @transform_5, window_bounds = array<i64: 2, 16, 256>}]} {
    %c0 = arith.constant 0 : index
    %c0_0 = arith.constant 0 : index
    %c0_1 = arith.constant 0 : index
    %0 = vector.load %arg1[%c0, %c0_0, %c0_1] : memref<2x16x256xf32, #tpu.memory_space<vmem>>, vector<2x16x256xf32>
    %cst = arith.constant dense<0.000000e+00> : vector<2x16xf32>
    %1 = vector.multi_reduction <add>, %0, %cst [2] : vector<2x16x256xf32> to vector<2x16xf32>
    %cst_2 = arith.constant 3.906250e-03 : f32
    %2 = vector.broadcast %cst_2 : f32 to vector<2x16xf32>
    %3 = arith.mulf %1, %2 : vector<2x16xf32>
    %cst_3 = arith.constant dense<0xFF800000> : vector<2x16xf32>
    %4 = vector.multi_reduction <maximumf>, %0, %cst_3 [2] : vector<2x16x256xf32> to vector<2x16xf32>
    %cst_4 = arith.constant 0.000000e+00 : f32
    %5 = vector.broadcast %cst_4 : f32 to vector<6x16xf32>
    %6 = tpu.concatenate %3, %5, %4, %5 in 0 : vector<2x16xf32>, vector<6x16xf32>, vector<2x16xf32>, vector<6x16xf32> -> vector<16x16xf32>
    %c0_5 = arith.constant 0 : index
    %c0_6 = arith.constant 0 : index
    %7 = vector.load %arg2[%c0_5, %c0_6] : memref<16x4xf32, #tpu.memory_space<vmem>>, vector<16x4xf32>
    %cst_7 = arith.constant dense<0.000000e+00> : vector<16x4xf32>
    %8 = tpu.matmul %6, %7, %cst_7 {dimension_numbers = #tpu.dot_dimension_numbers<[1], [0], [0], [1], [0, 0, 1, 1], [], []>} : vector<16x16xf32>, vector<16x4xf32>, vector<16x4xf32> -> vector<16x4xf32>
    %c0_8 = arith.constant 0 : index
    %c0_9 = arith.constant 0 : index
    %9 = vector.load %arg3[%c0_8, %c0_9] : memref<1x4xf32, #tpu.memory_space<vmem>>, vector<1x4xf32>
    %10 = vector.broadcast %9 : vector<1x4xf32> to vector<16x4xf32>
    %11 = arith.addf %8, %10 : vector<16x4xf32>
    %cst_10 = arith.constant 0.000000e+00 : f32
    %12 = vector.broadcast %cst_10 : f32 to vector<16x4xf32>
    %13 = arith.maximumf %11, %12 : vector<16x4xf32>
    %c0_11 = arith.constant 0 : index
    %c0_12 = arith.constant 0 : index
    %14 = vector.load %arg4[%c0_11, %c0_12] : memref<4x16xf32, #tpu.memory_space<vmem>>, vector<4x16xf32>
    %cst_13 = arith.constant dense<0.000000e+00> : vector<16x16xf32>
    %15 = tpu.matmul %13, %14, %cst_13 {dimension_numbers = #tpu.dot_dimension_numbers<[1], [0], [0], [1], [0, 0, 1, 1], [], []>} : vector<16x4xf32>, vector<4x16xf32>, vector<16x16xf32> -> vector<16x16xf32>
    %c0_14 = arith.constant 0 : index
    %c0_15 = arith.constant 0 : index
    %16 = vector.load %arg5[%c0_14, %c0_15] : memref<1x16xf32, #tpu.memory_space<vmem>>, vector<1x16xf32>
    %17 = vector.broadcast %16 : vector<1x16xf32> to vector<16x16xf32>
    %18 = arith.addf %15, %17 : vector<16x16xf32>
    %19 = vector.extract_strided_slice %18 {offsets = [0, 0], sizes = [2, 16], strides = [1, 1]} : vector<16x16xf32> to vector<2x16xf32>
    %20 = vector.extract_strided_slice %18 {offsets = [8, 0], sizes = [2, 16], strides = [1, 1]} : vector<16x16xf32> to vector<2x16xf32>
    %21 = arith.addf %19, %20 : vector<2x16xf32>
    %cst_16 = arith.constant 0.166666672 : f32
    %22 = vector.broadcast %cst_16 : f32 to vector<2x16xf32>
    %23 = arith.mulf %21, %22 : vector<2x16xf32>
    %cst_17 = arith.constant 5.000000e-01 : f32
    %24 = vector.broadcast %cst_17 : f32 to vector<2x16xf32>
    %25 = arith.addf %23, %24 : vector<2x16xf32>
    %cst_18 = arith.constant 0.000000e+00 : f32
    %cst_19 = arith.constant 1.000000e+00 : f32
    %26 = vector.broadcast %cst_18 : f32 to vector<2x16xf32>
    %27 = arith.maximumf %26, %25 : vector<2x16xf32>
    %28 = vector.broadcast %cst_19 : f32 to vector<2x16xf32>
    %29 = arith.minimumf %28, %27 : vector<2x16xf32>
    %30 = vector.shape_cast %29 : vector<2x16xf32> to vector<2x16x1xf32>
    %31 = vector.broadcast %30 : vector<2x16x1xf32> to vector<2x16x256xf32>
    %32 = arith.mulf %0, %31 : vector<2x16x256xf32>
    %c0_20 = arith.constant 0 : index
    %c0_21 = arith.constant 0 : index
    %c0_22 = arith.constant 0 : index
    %33 = vector.load %arg6[%c0_20, %c0_21, %c0_22] : memref<2x16x256xf32, #tpu.memory_space<vmem>>, vector<2x16x256xf32>
    tpu.vector_store %arg6[%c0_20, %c0_21, %c0_22], %32 {strides = array<i32>} : memref<2x16x256xf32, #tpu.memory_space<vmem>>, vector<2x16x256xf32>,
    return
  }
  func.func @transform_0(%arg0: i32) -> (i32, i32, i32) {
    %c0_i32 = arith.constant 0 : i32
    %c0_i32_0 = arith.constant 0 : i32
    %c0_i32_1 = arith.constant 0 : i32
    return %arg0, %c0_i32, %c0_i32_0 : i32, i32, i32
  }
  func.func @transform_1(%arg0: i32) -> (i32, i32) {
    %c0_i32 = arith.constant 0 : i32
    %c0_i32_0 = arith.constant 0 : i32
    %c0_i32_1 = arith.constant 0 : i32
    return %c0_i32, %c0_i32_0 : i32, i32
  }
  func.func @transform_2(%arg0: i32) -> (i32, i32) {
    %c0_i32 = arith.constant 0 : i32
    %c0_i32_0 = arith.constant 0 : i32
    %c0_i32_1 = arith.constant 0 : i32
    return %c0_i32, %c0_i32_0 : i32, i32
  }
  func.func @transform_3(%arg0: i32) -> (i32, i32) {
    %c0_i32 = arith.constant 0 : i32
    %c0_i32_0 = arith.constant 0 : i32
    %c0_i32_1 = arith.constant 0 : i32
    return %c0_i32, %c0_i32_0 : i32, i32
  }
  func.func @transform_4(%arg0: i32) -> (i32, i32) {
    %c0_i32 = arith.constant 0 : i32
    %c0_i32_0 = arith.constant 0 : i32
    %c0_i32_1 = arith.constant 0 : i32
    return %c0_i32, %c0_i32_0 : i32, i32
  }
  func.func @transform_5(%arg0: i32) -> (i32, i32, i32) {
    %c0_i32 = arith.constant 0 : i32
    %c0_i32_0 = arith.constant 0 : i32
    %c0_i32_1 = arith.constant 0 : i32
    return %arg0, %c0_i32, %c0_i32_0 : i32, i32, i32
  }
}

</mosaic_0001>

<bundles_post_ra>
// kernel: tpu_custom_call.1
= control target key start
LH: loop header
LB: loop body
LE: loop exit
PB: predicated region body
PF: predicated region fallthrough
CT: control target
= control target key end

     0   :  { %10 = vsyncpa [#allocation3], 0  ;;  %s587_s0 = inlined_call_operand.hbm [shape: f32[2,16,256], index: 0, kind: input, shape index: {}]   ;;  %s588_s1 = inlined_call_operand.vmem [shape: f32[16,4], index: 1, kind: input, shape index: {}]   ;;  %s589_s2 = inlined_call_operand.vmem [shape: f32[1,4], index: 2, kind: input, shape index: {}]   ;;  %s590_s3 = inlined_call_operand.vmem [shape: f32[4,16], index: 3, kind: input, shape index: {}]   ;;  %s591_s4 = inlined_call_operand.vmem [shape: f32[1,16], index: 4, kind: input, shape index: {}]   ;;  %s592_s5 = inlined_call_operand.hbm [shape: f32[2,16,256], index: 5, kind: output, shape index: {}]  }
   0x1   :  { %11 = vsyncpa [#allocation4], 0  ;;  %s456_s18 = smov [#allocation2]   ;;  %s408_s22 = scalar_lea.hbm %s587_s0, 1024 }
   0x2   :  { %s17_s19 = sshll.u32 %s456_s18, 4  ;;  %p409_p0 = scmp.ne.s32.totalorder %s587_s0, %s408_s22  ;;  %s18_s19 = int_to_ptr.vmem [resolvable:$true] %s17_s19 }
   0x3   :  { %p412_p1 = scmp.lt.u32.totalorder %s408_s22, %s587_s0 }
   0x5   :  { %p414_p2 = pnand %p412_p1, %p409_p0 }
   0x7   :  { %417 = shalt.err (!%p414_p2)
}
   0x8   :  { %s418_s27 = scalar_lea.vmem %s18_s19, 1024  ;;  %p423_p4 = scmp.lt.s32.totalorder %s18_s19, %s18_s19 }
   0x9   :  { %p419_p3 = scmp.ne.s32.totalorder %s18_s19, %s418_s27  ;;  %p424_p5 = scmp.lt.s32.totalorder %s418_s27, %s418_s27 }
   0xb   :  { %p425_p6 = por %p424_p5, %p423_p4 }
   0xd   :  { %p426_p7 = pnand %p425_p6, %p419_p3 }
   0xf   :  { %429 = shalt.err (!%p426_p7)
}
  0x10   :  { %s457_s28 = smov 256   ;;  %s458_s29 = smov 16  }
  0x11   :  { %23 = dma.hbm_to_vmem [thread:$0]  %s587_s0, 1024, %s18_s19, [#allocation3], %s457_s28, %s457_s28, %s458_s29  }
  0x12   :  { %452 = dma.done.wait [#allocation3], 1024  }
  0x13   :  { %453 = vsyncadd [#allocation3], 4294966272  ;;  %v505_v0 = vld [vmem:[#allocation2 + $0x20] sm:$0xff]  ;;  %v507_v1 = vld [vmem:[#allocation2 + $0x28] sm:$0xff]  ;;  %v75_v19 = vlaneseq  ;;  %vm86_vm0 = vcmask 130112   ;;  %vm97_vm1 = vcmask 1041409  }
  0x14   :  { %v509_v2 = vld [vmem:[#allocation2] sm:$0xff]  ;;  %v49_v3 = vadd.f32 %v507_v1, %v505_v0  ;;  %v513_v4 = vld [vmem:[#allocation2 + $0x8] sm:$0xff]  ;;  %v515_v5 = vld [vmem:[#allocation2 + $0x30] sm:$0xff]  ;;  %v65_v15 = vmax.f32 %v505_v0, %v507_v1  ;;  %vm124_vm2 = vcmask 1041408   ;;  %vm136_vm3 = vcmask 130048  }
  0x15   :  { %v517_v6 = vld [vmem:[#allocation2 + $0x38] sm:$0xff]  ;;  %v43_v7 = vadd.f32 %v513_v4, %v509_v2  ;;  %v521_v8 = vld [vmem:[#allocation2 + $0x10] sm:$0xff]  ;;  %v59_v13 = vmax.f32 %v509_v2, %v513_v4  ;;  %v127_v16 = vld [vmem:[%s588_s1] sm:$0xff]  ;;  %v76_v20 = vand.u32 127, %v75_v19  ;;  %v543_v21 = vshrl.u32 %v75_v19, 7 }
  0x16   :  { %v523_v9 = vld [vmem:[#allocation2 + $0x18] sm:$0xff]  ;;  %50 = vadd.xlane.f32.xlu1 %v49_v3  ;;  %v52_v10 = vadd.f32 %v517_v6, %v515_v5  ;;  %v68_v14 = vmax.f32 %v515_v5, %v517_v6  ;;  %v128_v17 = vld [vmem:[%s588_s1 + $0x8] sm:$0xff]  ;;  %v220_v53 = vld [vmem:[%s590_s3] sm:$0xf]  ;;  %vm235_vm4 = vcmask 1043456   ;;  %vm228_vm5 = vcmask 31744  }
  0x17   :  { %44 = vadd.xlane.f32.xlu0 %v43_v7  ;;  %v46_v11 = vadd.f32 %v523_v9, %v521_v8  ;;  %v62_v12 = vmax.f32 %v521_v8, %v523_v9  ;;  %v400_v18 = vpack.c.bf16 %v128_v17, %v127_v16  ;;  %v81_v22 = vadd.s32 4294967288, %v76_v20  ;;  %395 = vmatprep.subr.msk.mxu1 %vm235_vm4, %v220_v53  ;;  %v374_v54 = vld [vmem:[%s589_s2] ss:$0 sm:$0xff]  ;;  %s459_s2 = smov [#allocation5]  }
  0x18   :  { %v79_v25 = vsub.s32 %v76_v20, %v543_v21  ;;  %396 = vmatpush3.msk.msra.mxu1 %vm235_vm4, %v220_v53  ;;  %v377_v61 = vld [vmem:[%s591_s4] ss:$0 sm:$0xff]  ;;  %v332_v17 = vsub.s32 1, %v543_v21  ;;  %s362_s3 = sshll.u32 %s459_s2, 4  ;;  %s363_s3 = int_to_ptr.vmem [resolvable:$true] %s362_s3 }
  0x19   :  { %401 = vmatprep.subr.bf16.mxu0 %v400_v18  ;;  %v84_v27 = vsub.s32 %v81_v22, %v543_v21  ;;  %s430_s4 = scalar_lea.vmem %s363_s3, 1024  ;;  %p435_p9 = scmp.lt.s32.totalorder %s363_s3, %s363_s3 }
  0x1a   :  { %53 = vadd.xlane.f32.xlu1 %v52_v10  ;;  %403 = vmatpush3.bf16.msra.mxu0 %v400_v18  ;;  %p431_p8 = scmp.ne.s32.totalorder %s363_s3, %s430_s4  ;;  %p436_p10 = scmp.lt.s32.totalorder %s430_s4, %s430_s4 }
  0x1b   :  { %47 = vadd.xlane.f32.xlu0 %v46_v11 }
  0x1c   :  { %p437_p11 = por %p436_p10, %p435_p9 }
  0x1e   :  { %63 = vmax.xlane.f32.xlu1 %v62_v12  ;;  %p438_p12 = pnand %p437_p11, %p431_p8 }
  0x1f   :  { %60 = vmax.xlane.f32.xlu0 %v59_v13 }
  0x22   :  { %69 = vmax.xlane.f32.xlu1 %v68_v14  ;;  %v321_v14 = vsub.s32 0, %v543_v21 }
  0x23   :  { %66 = vmax.xlane.f32.xlu0 %v65_v15 }
  0xa3   :  { %v51_v23 = vpop.xlane.xlu1 %50 }
  0xa4   :  { %v45_v24 = vpop.xlane.xlu0 %44  ;;  %v57_v26 = vmul.f32 0.00390625, %v51_v23 }
  0xa5   :  { %v55_v28 = vmul.f32 0.00390625, %v45_v24 }
  0xa6   :  { %v91_v33 = vrot.slane %v57_v26, %v79_v25 }
  0xa7   :  { %v54_v29 = vpop.xlane.xlu1 %53  ;;  %v80_v35 = vrot.slane %v55_v28, %v79_v25 }
  0xa8   :  { %v58_v30 = vmul.f32 0.00390625, %v54_v29  ;;  %v48_v31 = vpop.xlane.xlu0 %47 }
  0xa9   :  { %v56_v32 = vmul.f32 0.00390625, %v48_v31 }
  0xaa   :  { %v95_v34 = vrot.slane %v58_v30, %v84_v27 }
  0xab   :  { %v85_v36 = vrot.slane %v56_v32, %v84_v27  ;;  %v64_v37 = vpop.xlane.xlu1 %63 }
  0xac   :  { %v61_v38 = vpop.xlane.xlu0 %60  ;;  %v96_v39 = vsel %vm86_vm0, %v95_v34, %v91_v33  ;;  %v111_v42 = vrot.slane %v64_v37, %v84_v27 }
  0xad   :  { %v87_v40 = vsel %vm86_vm0, %v85_v36, %v80_v35  ;;  %v107_v43 = vrot.slane %v61_v38, %v79_v25 }
  0xae   :  { %v98_v41 = vsel %vm97_vm1, %v96_v39, %v87_v40 }
  0xaf   :  { %v70_v44 = vpop.xlane.xlu1 %69  ;;  %v125_v45 = vsel %vm124_vm2, %v98_v41, 0.0  ;;  %v112_v49 = vsel %vm86_vm0, %v111_v42, %v107_v43 }
  0xb0   :  { %v120_v46 = vrot.slane %v70_v44, %v84_v27  ;;  %392 = vmatprep.mubr.msk.f32.mxu0 %vm136_vm3, %v125_v45  ;;  %v67_v47 = vpop.xlane.xlu0 %66 }
  0xb1   :  { %v116_v48 = vrot.slane %v67_v47, %v79_v25 }
  0xb3   :  { %v121_v50 = vsel %vm86_vm0, %v120_v46, %v116_v48 }
  0xb4   :  { %v122_v51 = vsel %vm97_vm1, %v121_v50, %v112_v49 }
  0xb5   :  { %v126_v52 = vsel %vm124_vm2, %v122_v51, 0.0 }
  0xb6   :  { %393 = vmatmul.mubr.msk.f32.vlgmr.msra.gmra.mrb[0].mxu0 %vm136_vm3, %v126_v52 }
 0x189   :  { %v394_v55 = vpop.f32.mrb[0].mxu0 }
 0x18a   :  { %v215_v56 = vadd.f32 %v394_v55, %v374_v54  ;;  %v209_v57 = vpop.f32.mrb[1].mxu0 }
 0x18b   :  { %v210_v58 = vadd.f32 %v374_v54, %v209_v57 }
 0x18c   :  { %v219_v60 = vmax.f32 %v215_v56, 0.0 }
 0x18d   :  { %v218_v59 = vmax.f32 %v210_v58, 0.0 }
 0x18f   :  { %397 = vmatprep.mubr.msk.f32.mxu1 %vm228_vm5, %v218_v59 }
 0x190   :  { %398 = vmatmul.mubr.msk.f32.vlgmr.msra.gmra.mrb[0].mxu1 %vm228_vm5, %v219_v60 }
 0x263   :  { %v399_v62 = vpop.f32.mrb[0].mxu1 }
 0x264   :  { %v311_v63 = vadd.f32 %v399_v62, %v377_v61  ;;  %v305_v3 = vpop.f32.mrb[1].mxu1 }
 0x265   :  { %v306_v7 = vadd.f32 %v377_v61, %v305_v3 }
 0x267   :  { %v314_v10 = vadd.f32 %v311_v63, %v306_v7 }
 0x269   :  { %v315_v11 = vmul.f32 0.16666667, %v314_v10 }
 0x26b   :  { %v316_v12 = vadd.f32 0.5, %v315_v11 }
 0x26d   :  { %v317_v13 = vmax.f32 %v316_v12, 0.0 }
 0x26f   :  { %v318_v15 = vmin.f32 %v317_v13, 1.0 }
 0x271   :  { %v322_v16 = vrot.slane %v318_v15, %v321_v14  ;;  %v333_v18 = vrot.slane %v318_v15, %v332_v17 }
 0x273   :  { %328 = vbcast.lane.b32.xlu1 %v322_v16, 264  ;;  %324 = vbcast.lane.b32.xlu0 %v322_v16, 256 }
 0x277   :  { %335 = vbcast.lane.b32.xlu1 %v333_v18, 256 }
 0x27b   :  { %339 = vbcast.lane.b32.xlu1 %v333_v18, 264 }
 0x2e5   :  { %v329_v19 = vpop.permute.xlu1 %328  ;;  %v325_v20 = vpop.permute.xlu0 %324 }
 0x2e6   :  { %v343_v22 = vmul.f32 %v329_v19, %v521_v8  ;;  %v344_v23 = vmul.f32 %v329_v19, %v523_v9  ;;  %v341_v24 = vmul.f32 %v325_v20, %v509_v2  ;;  %v342_v25 = vmul.f32 %v325_v20, %v513_v4 }
 0x2e8   :  { %351 = vst [vmem:[#allocation5 + $0x10] sm:$0xff] %v343_v22  ;;  %352 = vst [vmem:[#allocation5 + $0x18] sm:$0xff] %v344_v23 }
 0x2e9   :  { %349 = vst [vmem:[#allocation5] sm:$0xff] %v341_v24  ;;  %350 = vst [vmem:[#allocation5 + $0x8] sm:$0xff] %v342_v25  ;;  %v336_v21 = vpop.permute.xlu1 %335 }
 0x2ea   :  { %v345_v26 = vmul.f32 %v336_v21, %v505_v0  ;;  %v346_v27 = vmul.f32 %v336_v21, %v507_v1 }
 0x2ec   :  { %353 = vst [vmem:[#allocation5 + $0x20] sm:$0xff] %v345_v26  ;;  %354 = vst [vmem:[#allocation5 + $0x28] sm:$0xff] %v346_v27 }
 0x2ed   :  { %v340_v8 = vpop.permute.xlu1 %339 }
 0x2ee   :  { %v347_v9 = vmul.f32 %v340_v8, %v515_v5  ;;  %v348_v2 = vmul.f32 %v340_v8, %v517_v6 }
 0x2f0   :  { %355 = vst [vmem:[#allocation5 + $0x30] sm:$0xff] %v347_v9  ;;  %356 = vst [vmem:[#allocation5 + $0x38] sm:$0xff] %v348_v2 }
 0x2f1   :  { %441 = shalt.err (!%p438_p12)
}
 0x2f2   :  { %s442_s17 = scalar_lea.hbm %s592_s5, 1024 }
 0x2f3   :  { %p443_p13 = scmp.ne.s32.totalorder %s592_s5, %s442_s17  ;;  %p446_p0 = scmp.lt.u32.totalorder %s442_s17, %s592_s5 }
 0x2f5   :  { %p448_p1 = pnand %p446_p0, %p443_p13 }
 0x2f7   :  { %451 = shalt.err (!%p448_p1)
}
 0x2f8   :  { %368 = dma.vmem_to_hbm [thread:$0]  %s363_s3, 1024, %s592_s5, [#allocation4], %s457_s28, %s457_s28, %s458_s29  }
 0x2f9   :  { %454 = dma.done.wait [#allocation4], 1024  }
 0x2fa   :  { %455 = vsyncadd [#allocation4], 4294966272 }
 0x2fb   :  { %372 = vsyncpa [#allocation3], 1 }
 0x2fc   :  { %373 = vsyncpa [#allocation4], 1 }

</bundles_post_ra>
